<compile_context>
chip_gen: v7x
topology: tpu7x:2x2x1
jax: 0.10.0
libtpu: 0.0.40
codegen_flags: <defaults>
</compile_context>

<pallas_src>
import functools

import jax
import jax.numpy as jnp
from jax.experimental import pallas as pl
from jax.experimental.pallas import tpu as pltpu


def _round_up(v, m):
    return ((v + m - 1) // m) * m


def _balanced_tile(dim, cap, align):
    """Largest tile <= cap (multiple of `align`) keeping the last tile mostly full."""
    dim = max(int(dim), 1)
    n_tiles = pl.cdiv(dim, cap)
    return max(align, min(cap, _round_up(pl.cdiv(dim, n_tiles), align)))


def _vmem_capacity_bytes():
    try:
        return int(pltpu.get_tpu_info().vmem_capacity_bytes)
    except Exception:
        return 64 * 1024 * 1024  # conservative: v7x per-TC VMEM


def _linear_kernel(x_ref, wt_ref, b_ref, o_ref):
    """One (tm, tn) output tile; grid = (M, N, K), K innermost.

    x_ref:  (tm, tk) activation tile
    wt_ref: (tk, tn) weight tile, pre-transposed to (In, Out) in the wrapper
    b_ref:  (1, tn)  bias tile (consumed only on the final K step)
    o_ref:  (tm, tn) f32 output tile — resident across K, used as accumulator
    """
    k = pl.program_id(2)

    @pl.when(k == 0)
    def _():
        o_ref[...] = jnp.zeros_like(o_ref)

    # MXU-native (tm,tk)@(tk,tn) contraction with f32 accumulation.
    o_ref[...] += jnp.dot(x_ref[...], wt_ref[...],
                          preferred_element_type=jnp.float32)

    # Epilogue once, on the last K step: bias add (output already f32).
    @pl.when(k == pl.num_programs(2) - 1)
    def _():
        o_ref[...] += b_ref[...]


@functools.partial(jax.jit, static_argnames=("compute_dtype", "force_kernel"))
def linear_forward(x, weight, bias, *, compute_dtype=jnp.float32,
                   force_kernel=False):
    """torch.nn.Linear forward: y = x @ weight.T + bias.

    x:      (B, In)   float32
    weight: (Out, In) float32 (PyTorch layout)
    bias:   (Out,)    float32
    returns (B, Out)  float32
    """
    B, In = x.shape
    Out, In_w = weight.shape
    assert In == In_w, "weight inner dim must match x inner dim"

    # ---- small-problem fast path: XLA's fused matmul beats kernel launch ----
    if not force_kernel and (2 * B * In * Out) < (1 << 27):
        return (x @ weight.T + bias).astype(jnp.float32)

    itemsize = jnp.dtype(compute_dtype).itemsize
    big_vmem = _vmem_capacity_bytes() >= 100 * 1024 * 1024  # v5e / v6e (128 MiB)

    m_align = 8 if itemsize >= 4 else 16          # sublane pack: f32=8, bf16=16
    if big_vmem:
        cap_m = cap_n = 1024
        vmem_limit = 96 * 1024 * 1024
    else:  # v7x: 64 MiB VMEM/TC — keep double-buffered totals under ~48 MiB
        cap_m = cap_n = 512 if itemsize >= 4 else 1024
        vmem_limit = 48 * 1024 * 1024
    cap_k = 1024 if itemsize >= 4 else 2048

    tm = _balanced_tile(B, cap_m, m_align)
    tn = _balanced_tile(Out, cap_n, 128)
    tk = _balanced_tile(In, cap_k, 256)           # K always a 256 multiple

    # v7x has 2 TensorCores sharded over the parallel axes; avoid a 1x1xK grid.
    if (not big_vmem and tn >= 256
            and pl.cdiv(B, tm) * pl.cdiv(Out, tn) == 1):
        tn = _round_up(tn // 2, 128)

    Mp, Np, Kp = _round_up(B, tm), _round_up(Out, tn), _round_up(In, tk)

    # Pre-transpose W once to (In, Out) and pad everything to tile-aligned
    # shapes (one fused XLA pass). Zero K-padding is numerically inert; M/N
    # padding is sliced off at the end and keeps loads/stores lane-dense.
    x_p = x.astype(compute_dtype)
    wt_p = weight.T.astype(compute_dtype)
    if (Mp, Kp) != (B, In):
        x_p = jnp.pad(x_p, ((0, Mp - B), (0, Kp - In)))
    if (Kp, Np) != (In, Out):
        wt_p = jnp.pad(wt_p, ((0, Kp - In), (0, Np - Out)))
    b_p = bias.astype(jnp.float32)
    if Np != Out:
        b_p = jnp.pad(b_p, (0, Np - Out))
    b_p = b_p.reshape(1, Np)                      # 2-D for TPU lane layout

    grid = (Mp // tm, Np // tn, Kp // tk)

    cost = pl.CostEstimate(
        flops=2 * Mp * Np * Kp,
        transcendentals=0,
        bytes_accessed=itemsize * (Mp * Kp * grid[1] + Kp * Np * grid[0])
        + 4 * (Mp * Np + Np),
    )

    out_p = pl.pallas_call(
        _linear_kernel,
        out_shape=jax.ShapeDtypeStruct((Mp, Np), jnp.float32),
        grid_spec=pltpu.PrefetchScalarGridSpec(
            num_scalar_prefetch=0,
            grid=grid,
            in_specs=[
                pl.BlockSpec((tm, tk), lambda i, j, k: (i, k)),   # x
                pl.BlockSpec((tk, tn), lambda i, j, k: (k, j)),   # W^T
                pl.BlockSpec((1, tn), lambda i, j, k: (0, j)),    # bias
            ],
            out_specs=pl.BlockSpec((tm, tn), lambda i, j, k: (i, j)),
        ),
        compiler_params=pltpu.CompilerParams(
            dimension_semantics=("parallel", "parallel", "arbitrary"),
            vmem_limit_bytes=vmem_limit,
        ),
        cost_estimate=cost,
    )(x_p, wt_p, b_p)

    # Slice away the row / lane padding.
    return out_p[:B, :Out]


if __name__ == "__main__":
    # Model config consistent with LinearRegression(inputSize, outputSize).
    input_size, output_size = 32, 16
    batch = 8

    key = jax.random.PRNGKey(0)
    kx, kw, kb = jax.random.split(key, 3)

    # PyTorch-style Linear params: W (out, in), b (out,).
    bound = 1.0 / (input_size ** 0.5)
    weight = jax.random.uniform(kw, (output_size, input_size),
                                minval=-bound, maxval=bound, dtype=jnp.float32)
    bias = jax.random.uniform(kb, (output_size,),
                              minval=-bound, maxval=bound, dtype=jnp.float32)
    x = jax.random.normal(kx, (batch, input_size), dtype=jnp.float32)

    ref = x @ weight.T + bias

    # Pallas kernel path, f32 operands: tight tolerance.
    out_f32 = jax.block_until_ready(
        linear_forward(x, weight, bias, compute_dtype=jnp.float32,
                       force_kernel=True))
    assert out_f32.shape == (batch, output_size)
    assert jnp.allclose(out_f32, ref, atol=1e-5, rtol=1e-5)

    # Pallas kernel path, bf16 operands / f32 accumulation: looser tolerance.
    out_bf16 = jax.block_until_ready(
        linear_forward(x, weight, bias, compute_dtype=jnp.bfloat16,
                       force_kernel=True))
    assert out_bf16.shape == (batch, output_size)
    assert jnp.allclose(out_bf16, ref, atol=5e-2, rtol=5e-2)

    # Small-problem fast path (what production would use at this size).
    out_fast = jax.block_until_ready(linear_forward(x, weight, bias))
    assert jnp.allclose(out_fast, ref, atol=1e-5, rtol=1e-5)

    print("KERNEL_OK")
</pallas_src>

<mosaic_0001>
module attributes {stable_mosaic.version = 11 : i64} {
  func.func @_linear_kernel(%arg0: i32, %arg1: i32, %arg2: i32, %arg3: memref<8x256xf32, #tpu.memory_space<vmem>>, %arg4: memref<256x128xf32, #tpu.memory_space<vmem>>, %arg5: memref<1x128xf32, #tpu.memory_space<vmem>>, %arg6: memref<8x128xf32, #tpu.memory_space<vmem>>) attributes {dimension_semantics = [#tpu.dimension_semantics<parallel>, #tpu.dimension_semantics<parallel>, #tpu.dimension_semantics<arbitrary>], iteration_bounds = array<i64: 1, 1, 1>, scalar_prefetch = 0 : i64, scratch_operands = 0 : i64, tpu.core_type = #tpu.core_type<tc>, window_params = [{transform_indices = @transform_0, window_bounds = array<i64: 8, 256>}, {transform_indices = @transform_1, window_bounds = array<i64: 256, 128>}, {transform_indices = @transform_2, window_bounds = array<i64: 1, 128>}, {transform_indices = @transform_3, window_bounds = array<i64: 8, 128>}]} {
    %c0_i32 = arith.constant 0 : i32
    %0 = arith.cmpi eq, %arg2, %c0_i32 : i32
    %1 = arith.extui %0 : i1 to i32
    %c0_i32_0 = arith.constant 0 : i32
    %2 = arith.cmpi ne, %1, %c0_i32_0 : i32
    scf.if %2 {
      %cst_10 = arith.constant 0.000000e+00 : f32
      %12 = vector.broadcast %cst_10 : f32 to vector<8x128xf32>
      %c0_11 = arith.constant 0 : index
      %c0_12 = arith.constant 0 : index
      %13 = vector.load %arg6[%c0_11, %c0_12] : memref<8x128xf32, #tpu.memory_space<vmem>>, vector<8x128xf32>
      tpu.vector_store %arg6[%c0_11, %c0_12], %12 {strides = array<i32>} : memref<8x128xf32, #tpu.memory_space<vmem>>, vector<8x128xf32>,
    } else {
    }
    %c0 = arith.constant 0 : index
    %c0_1 = arith.constant 0 : index
    %3 = vector.load %arg6[%c0, %c0_1] : memref<8x128xf32, #tpu.memory_space<vmem>>, vector<8x128xf32>
    %c0_2 = arith.constant 0 : index
    %c0_3 = arith.constant 0 : index
    %4 = vector.load %arg3[%c0_2, %c0_3] : memref<8x256xf32, #tpu.memory_space<vmem>>, vector<8x256xf32>
    %c0_4 = arith.constant 0 : index
    %c0_5 = arith.constant 0 : index
    %5 = vector.load %arg4[%c0_4, %c0_5] : memref<256x128xf32, #tpu.memory_space<vmem>>, vector<256x128xf32>
    %cst = arith.constant dense<0.000000e+00> : vector<8x128xf32>
    %6 = tpu.matmul %4, %5, %cst {dimension_numbers = #tpu.dot_dimension_numbers<[1], [0], [0], [1], [0, 0, 1, 1], [], []>} : vector<8x256xf32>, vector<256x128xf32>, vector<8x128xf32> -> vector<8x128xf32>
    %7 = arith.addf %3, %6 : vector<8x128xf32>
    %c0_6 = arith.constant 0 : index
    %c0_7 = arith.constant 0 : index
    %8 = vector.load %arg6[%c0_6, %c0_7] : memref<8x128xf32, #tpu.memory_space<vmem>>, vector<8x128xf32>
    tpu.vector_store %arg6[%c0_6, %c0_7], %7 {strides = array<i32>} : memref<8x128xf32, #tpu.memory_space<vmem>>, vector<8x128xf32>,
    %c0_i32_8 = arith.constant 0 : i32
    %9 = arith.cmpi eq, %arg2, %c0_i32_8 : i32
    %10 = arith.extui %9 : i1 to i32
    %c0_i32_9 = arith.constant 0 : i32
    %11 = arith.cmpi ne, %10, %c0_i32_9 : i32
    scf.if %11 {
      %c0_10 = arith.constant 0 : index
      %c0_11 = arith.constant 0 : index
      %12 = vector.load %arg6[%c0_10, %c0_11] : memref<8x128xf32, #tpu.memory_space<vmem>>, vector<8x128xf32>
      %c0_12 = arith.constant 0 : index
      %c0_13 = arith.constant 0 : index
      %13 = vector.load %arg5[%c0_12, %c0_13] : memref<1x128xf32, #tpu.memory_space<vmem>>, vector<1x128xf32>
      %14 = vector.broadcast %13 : vector<1x128xf32> to vector<8x128xf32>
      %15 = arith.addf %12, %14 : vector<8x128xf32>
      %c0_14 = arith.constant 0 : index
      %c0_15 = arith.constant 0 : index
      %16 = vector.load %arg6[%c0_14, %c0_15] : memref<8x128xf32, #tpu.memory_space<vmem>>, vector<8x128xf32>
      tpu.vector_store %arg6[%c0_14, %c0_15], %15 {strides = array<i32>} : memref<8x128xf32, #tpu.memory_space<vmem>>, vector<8x128xf32>,
    } else {
    }
    return
  }
  func.func @transform_0(%arg0: i32, %arg1: i32, %arg2: i32) -> (i32, i32) {
    %c0_i32 = arith.constant 0 : i32
    return %arg0, %arg2 : i32, i32
  }
  func.func @transform_1(%arg0: i32, %arg1: i32, %arg2: i32) -> (i32, i32) {
    %c0_i32 = arith.constant 0 : i32
    return %arg2, %arg1 : i32, i32
  }
  func.func @transform_2(%arg0: i32, %arg1: i32, %arg2: i32) -> (i32, i32) {
    %c0_i32 = arith.constant 0 : i32
    %c0_i32_0 = arith.constant 0 : i32
    return %c0_i32, %arg1 : i32, i32
  }
  func.func @transform_3(%arg0: i32, %arg1: i32, %arg2: i32) -> (i32, i32) {
    %c0_i32 = arith.constant 0 : i32
    return %arg0, %arg1 : i32, i32
  }
}

</mosaic_0001>

<bundles_post_ra>
// kernel: linear_forward.1
= control target key start
LH: loop header
LB: loop body
LE: loop exit
PB: predicated region body
PF: predicated region fallthrough
CT: control target
= control target key end

     0   :  { %s386_s0 = inlined_call_operand.vmem [shape: f32[8,256], index: 0, kind: input, shape index: {}]   ;;  %s387_s1 = inlined_call_operand.vmem [shape: f32[256,128], index: 1, kind: input, shape index: {}]   ;;  %s388_s2 = inlined_call_operand.vmem [shape: f32[1,128], index: 2, kind: input, shape index: {}]   ;;  %s389_s3 = inlined_call_operand.hbm [shape: f32[8,128], index: 3, kind: output, shape index: {}]  }
   0x1   :  { %v39_v0 = vld [vmem:[%s387_s1 + $0x80] sm:$0xff]  ;;  %v40_v1 = vld [vmem:[%s387_s1 + $0x88] sm:$0xff]  ;;  %v41_v5 = vld [vmem:[%s387_s1 + $0x90] sm:$0xff] }
   0x2   :  { %v23_v2 = vld [vmem:[%s387_s1] sm:$0xff]  ;;  %v190_v3 = vpack.c.bf16 %v40_v1, %v39_v0  ;;  %v24_v4 = vld [vmem:[%s387_s1 + $0x8] sm:$0xff]  ;;  %v42_v6 = vld [vmem:[%s387_s1 + $0x98] sm:$0xff] }
   0x3   :  { %v192_v7 = vpack.c.bf16 %v24_v4, %v23_v2  ;;  %v194_v8 = vpack.c.bf16 %v42_v6, %v41_v5  ;;  %v25_v9 = vld [vmem:[%s387_s1 + $0x10] sm:$0xff]  ;;  %v26_v10 = vld [vmem:[%s387_s1 + $0x18] sm:$0xff]  ;;  %v43_v11 = vld [vmem:[%s387_s1 + $0xa0] sm:$0xff] }
   0x4   :  { %191 = vmatprep.subr.bf16.mxu0 %v190_v3  ;;  %v44_v12 = vld [vmem:[%s387_s1 + $0xa8] sm:$0xff]  ;;  %v196_v13 = vpack.c.bf16 %v26_v10, %v25_v9  ;;  %v27_v15 = vld [vmem:[%s387_s1 + $0x20] sm:$0xff]  ;;  %v45_v17 = vld [vmem:[%s387_s1 + $0xb0] sm:$0xff] }
   0x5   :  { %193 = vmatpush3.bf16.msra.mxu0 %v192_v7  ;;  %v198_v14 = vpack.c.bf16 %v44_v12, %v43_v11  ;;  %v28_v16 = vld [vmem:[%s387_s1 + $0x28] sm:$0xff]  ;;  %v46_v18 = vld [vmem:[%s387_s1 + $0xb8] sm:$0xff]  ;;  %v29_v21 = vld [vmem:[%s387_s1 + $0x30] sm:$0xff] }
   0x6   :  { %195 = vmatprep.subr.bf16.mxu0 %v194_v8  ;;  %v200_v19 = vpack.c.bf16 %v28_v16, %v27_v15  ;;  %v202_v20 = vpack.c.bf16 %v46_v18, %v45_v17  ;;  %v30_v22 = vld [vmem:[%s387_s1 + $0x38] sm:$0xff]  ;;  %v47_v23 = vld [vmem:[%s387_s1 + $0xc0] sm:$0xff]  ;;  %v48_v24 = vld [vmem:[%s387_s1 + $0xc8] sm:$0xff] }
   0x7   :  { %v22_v25 = vld [vmem:[%s386_s0 + $0x8] sm:$0xff] }
   0x8   :  { %119 = vmatprep.mubr.f32.mxu0 %v22_v25 }
   0x9   :  { %197 = vmatpush3.bf16.msra.mxu0 %v196_v13 }
   0xa   :  { %199 = vmatprep.subr.bf16.mxu0 %v198_v14 }
   0xb   :  { %8 = vsyncpa [#allocation3], 0  ;;  %v204_v26 = vpack.c.bf16 %v30_v22, %v29_v21  ;;  %v206_v27 = vpack.c.bf16 %v48_v24, %v47_v23  ;;  %v31_v28 = vld [vmem:[%s387_s1 + $0x40] sm:$0xff]  ;;  %v32_v29 = vld [vmem:[%s387_s1 + $0x48] sm:$0xff]  ;;  %s248_s28 = smov [#allocation2]  }
   0xc   :  { %v49_v30 = vld [vmem:[%s387_s1 + $0xd0] sm:$0xff]  ;;  %v50_v31 = vld [vmem:[%s387_s1 + $0xd8] sm:$0xff]  ;;  %v208_v32 = vpack.c.bf16 %v32_v29, %v31_v28  ;;  %v51_v36 = vld [vmem:[%s387_s1 + $0xe0] sm:$0xff]  ;;  %s146_s29 = sshll.u32 %s248_s28, 4  ;;  %s147_s29 = int_to_ptr.vmem [resolvable:$true] %s146_s29 }
   0xd   :  { %201 = vmatpush3.bf16.msra.mxu0 %v200_v19  ;;  %v210_v33 = vpack.c.bf16 %v50_v31, %v49_v30  ;;  %v33_v34 = vld [vmem:[%s387_s1 + $0x50] sm:$0xff]  ;;  %v34_v35 = vld [vmem:[%s387_s1 + $0x58] sm:$0xff]  ;;  %v52_v37 = vld [vmem:[%s387_s1 + $0xe8] sm:$0xff]  ;;  %p229_p1 = scmp.lt.s32.totalorder %s147_s29, %s147_s29 }
   0xe   :  { %203 = vmatprep.subr.bf16.mxu0 %v202_v20  ;;  %v212_v38 = vpack.c.bf16 %v34_v35, %v33_v34  ;;  %v214_v39 = vpack.c.bf16 %v52_v37, %v51_v36  ;;  %v35_v40 = vld [vmem:[%s387_s1 + $0x60] sm:$0xff]  ;;  %v36_v41 = vld [vmem:[%s387_s1 + $0x68] sm:$0xff]  ;;  %v53_v42 = vld [vmem:[%s387_s1 + $0xf0] sm:$0xff] }
   0xf   :  { %v54_v43 = vld [vmem:[%s387_s1 + $0xf8] sm:$0xff]  ;;  %v216_v44 = vpack.c.bf16 %v36_v41, %v35_v40  ;;  %v37_v46 = vld [vmem:[%s387_s1 + $0x70] sm:$0xff]  ;;  %v21_v49 = vld [vmem:[%s386_s0] sm:$0xff] }
  0x10   :  { %v218_v45 = vpack.c.bf16 %v54_v43, %v53_v42  ;;  %v38_v47 = vld [vmem:[%s387_s1 + $0x78] sm:$0xff]  ;;  %v154_v53 = vld [vmem:[%s388_s2] ss:$0 sm:$0xff]  ;;  %s224_s1 = scalar_lea.vmem %s147_s29, 128 }
  0x11   :  { %205 = vmatpush3.bf16.msra.mxu0 %v204_v26  ;;  %v220_v48 = vpack.c.bf16 %v38_v47, %v37_v46  ;;  %p225_p0 = scmp.ne.s32.totalorder %s147_s29, %s224_s1  ;;  %p230_p2 = scmp.lt.s32.totalorder %s224_s1, %s224_s1 }
  0x12   :  { %207 = vmatprep.subr.bf16.mxu0 %v206_v27 }
  0x13   :  { %p231_p3 = por %p230_p2, %p229_p1 }
  0x15   :  { %209 = vmatpush3.bf16.msra.mxu0 %v208_v32  ;;  %p232_p4 = pnand %p231_p3, %p225_p0 }
  0x16   :  { %211 = vmatprep.subr.bf16.mxu0 %v210_v33 }
  0x19   :  { %213 = vmatpush3.bf16.msra.mxu0 %v212_v38 }
  0x1a   :  { %215 = vmatprep.subr.bf16.mxu0 %v214_v39 }
  0x1d   :  { %217 = vmatpush3.bf16.msra.mxu0 %v216_v44 }
  0x1e   :  { %219 = vmatprep.subr.bf16.mxu0 %v218_v45 }
  0x21   :  { %221 = vmatpush3.bf16.msra.mxu0 %v220_v48 }
  0x24   :  { %120 = vmatmul.mubr.f32.vlgmr.msra.gmra.mrb[0].mxu0 %v21_v49 }
  0xf7   :  { %v187_v50 = vpop.f32.mrb[0].mxu0 }
  0xf8   :  { %v188_v51 = vpop.f32.mrb[1].mxu0 }
  0xf9   :  { %v189_v52 = vadd.f32 %v188_v51, %v187_v50 }
  0xfb   :  { %v138_v54 = vadd.f32 %v189_v52, %v154_v53 }
  0xfd   :  { %139 = vst [vmem:[#allocation2] sm:$0xff] %v138_v54 }
  0xfe   :  { %235 = shalt.err (!%p232_p4)
}
  0xff   :  { %s236_s4 = scalar_lea.hbm %s389_s3, 128 }
 0x100   :  { %p237_p5 = scmp.ne.s32.totalorder %s389_s3, %s236_s4  ;;  %p240_p6 = scmp.lt.u32.totalorder %s236_s4, %s389_s3 }
 0x102   :  { %p242_p7 = pnand %p240_p6, %p237_p5 }
 0x104   :  { %245 = shalt.err (!%p242_p7)
}
 0x105   :  { %149 = dma.vmem_to_hbm [thread:$0]  %s147_s29, 128, %s389_s3, [#allocation3]  }
 0x106   :  { %246 = dma.done.wait [#allocation3], 128  }
 0x107   :  { %247 = vsyncadd [#allocation3], 4294967168 }
 0x108   :  { %153 = vsyncpa [#allocation3], 1 }

</bundles_post_ra>
